<compile_context>
chip_gen: v7x
topology: tpu7x:2x2x1
jax: 0.10.0
libtpu: 0.0.40
codegen_flags: <defaults>
</compile_context>

<pallas_src>
import functools

import jax
import jax.numpy as jnp
from jax import lax
from jax.experimental import pallas as pl
from jax.experimental.pallas import tpu as pltpu


def _round_up(x, m):
    return ((x + m - 1) // m) * m


def micam_head_kernel(
    nrows_ref,                                   # SMEM scalar-prefetch: (1,) int32, true batch size
    z_ref, eps_ref, props_ref,                   # (TB, Hp) (TB, Lp) (TB, Pp) activations
    wmv_ref, bmv_ref,                            # fused [w_mean | w_logvar]: (Hp, 2Lp), (1, 2Lp)
    w1_ref, b1_ref, w2_ref, b2_ref, w3_ref, b3_ref,  # prop_pred MLP
    z_out_ref, pred_out_ref,                     # (TB, Lp) (TB, Pp)
    kl_part_ref, se_part_ref,                    # (1, 8, 128) per-block partial sums (lane-dense)
):
    i = pl.program_id(0)
    tb = z_ref.shape[0]
    lp = eps_ref.shape[1]

    z = z_ref[...]                               # (TB, Hp)

    # ---- rsample (perturb=True path), fused mean/logvar projection ----
    mv = jnp.dot(z, wmv_ref[...], preferred_element_type=jnp.float32) + bmv_ref[...]
    z_mean = mv[:, :lp]                                       # static lane-aligned slices
    z_log_var = jnp.minimum(mv[:, lp:], 10.0)                 # torch.clamp_max(., 10)

    s = jnp.exp(0.5 * z_log_var)                              # single EUP exp; s*s == exp(lv)
    z_lat = z_mean + s * eps_ref[...]
    z_out_ref[...] = z_lat

    # row-validity mask (padded batch rows contribute 0 to both losses)
    row = lax.broadcasted_iota(jnp.int32, (tb, 1), 0) + i * tb
    mask = (row < nrows_ref[0]).astype(jnp.float32)           # (TB, 1)

    # KL partial sum:  -0.5 * sum(1 + lv - mu^2 - exp(lv))  over valid rows.
    # Zero-padded latent columns give 1 + 0 - 0 - 1 = 0, so they drop out.
    kl_terms = (1.0 + z_log_var - z_mean * z_mean - s * s) * mask
    kl_part = -0.5 * jnp.sum(kl_terms)

    # ---- prop_pred MLP: latent -> hidden -> hidden -> num_props ----
    h = jnp.dot(z_lat, w1_ref[...], preferred_element_type=jnp.float32) + b1_ref[...]
    h = jnp.maximum(h, 0.0)
    h = jnp.dot(h, w2_ref[...], preferred_element_type=jnp.float32) + b2_ref[...]
    h = jnp.maximum(h, 0.0)
    pred = jnp.dot(h, w3_ref[...], preferred_element_type=jnp.float32) + b3_ref[...]
    pred_out_ref[...] = pred

    # squared-error partial sum (padded prop columns are exactly 0-0=0)
    diff = (pred - props_ref[...]) * mask
    se_part = jnp.sum(diff * diff)

    # one full unmasked vreg store each (lane-dense (8,128) slab)
    kl_part_ref[...] = jnp.full(kl_part_ref.shape, kl_part, dtype=jnp.float32)
    se_part_ref[...] = jnp.full(se_part_ref.shape, se_part, dtype=jnp.float32)


def micam_head(z, eps, props, params, beta, prop_weight, block_rows=None, perturb=True):
    """Fused rsample + prop_pred + losses.  Returns (z_latent, pred, kl, pred_loss, total)."""
    B, H = z.shape
    L = params["w_mean"].shape[1]
    P = params["w3"].shape[1]

    Hp = _round_up(H, 128)
    Lp = _round_up(L, 128)
    Pp = _round_up(P, 128)

    if block_rows is None:
        TB = min(256, _round_up(B, 8))
    else:
        TB = _round_up(block_rows, 8)
    Bp = _round_up(B, TB)
    nb = Bp // TB

    def pad2(x, r, c):
        x = x.astype(jnp.float32)
        return jnp.pad(x, ((0, r - x.shape[0]), (0, c - x.shape[1])))

    if not perturb:                       # dev / perturb=False path: z = z_mean
        eps = jnp.zeros_like(eps)

    z_p = pad2(z, Bp, Hp)
    eps_p = pad2(eps, Bp, Lp)
    props_p = pad2(props, Bp, Pp)

    # Fuse mean/logvar projections: one (Hp, 2*Lp) weight, one (1, 2*Lp) bias.
    w_mv = jnp.concatenate([pad2(params["w_mean"], Hp, Lp),
                            pad2(params["w_logvar"], Hp, Lp)], axis=1)
    b_mv = jnp.concatenate([pad2(params["b_mean"], 1, Lp),
                            pad2(params["b_logvar"], 1, Lp)], axis=1)
    w1 = pad2(params["w1"], Lp, Hp); b1 = pad2(params["b1"], 1, Hp)
    w2 = pad2(params["w2"], Hp, Hp); b2 = pad2(params["b2"], 1, Hp)
    w3 = pad2(params["w3"], Hp, Pp); b3 = pad2(params["b3"], 1, Pp)

    n_rows = jnp.array([B], dtype=jnp.int32)

    grid_spec = pltpu.PrefetchScalarGridSpec(
        num_scalar_prefetch=1,
        grid=(nb,),
        in_specs=[
            pl.BlockSpec((TB, Hp), lambda i, n: (i, 0)),        # z
            pl.BlockSpec((TB, Lp), lambda i, n: (i, 0)),        # eps
            pl.BlockSpec((TB, Pp), lambda i, n: (i, 0)),        # props
            pl.BlockSpec((Hp, 2 * Lp), lambda i, n: (0, 0)),    # fused mean/logvar weight (resident)
            pl.BlockSpec((1, 2 * Lp), lambda i, n: (0, 0)),     # fused bias
            pl.BlockSpec((Lp, Hp), lambda i, n: (0, 0)),        # w1
            pl.BlockSpec((1, Hp), lambda i, n: (0, 0)),         # b1
            pl.BlockSpec((Hp, Hp), lambda i, n: (0, 0)),        # w2
            pl.BlockSpec((1, Hp), lambda i, n: (0, 0)),         # b2
            pl.BlockSpec((Hp, Pp), lambda i, n: (0, 0)),        # w3
            pl.BlockSpec((1, Pp), lambda i, n: (0, 0)),         # b3
        ],
        out_specs=(
            pl.BlockSpec((TB, Lp), lambda i, n: (i, 0)),        # z latent
            pl.BlockSpec((TB, Pp), lambda i, n: (i, 0)),        # pred
            pl.BlockSpec((1, 8, 128), lambda i, n: (i, 0, 0)),  # kl partial
            pl.BlockSpec((1, 8, 128), lambda i, n: (i, 0, 0)),  # sq-err partial
        ),
    )

    out_shapes = (
        jax.ShapeDtypeStruct((Bp, Lp), jnp.float32),
        jax.ShapeDtypeStruct((Bp, Pp), jnp.float32),
        jax.ShapeDtypeStruct((nb, 8, 128), jnp.float32),
        jax.ShapeDtypeStruct((nb, 8, 128), jnp.float32),
    )

    z_lat_p, pred_p, kl_part, se_part = pl.pallas_call(
        micam_head_kernel,
        out_shape=out_shapes,
        grid_spec=grid_spec,
        compiler_params=pltpu.CompilerParams(dimension_semantics=("parallel",)),
    )(n_rows, z_p, eps_p, props_p, w_mv, b_mv, w1, b1, w2, b2, w3, b3)

    # Reduce per-block partials; normalize by TRUE counts (not padded shapes).
    kl = jnp.sum(kl_part[:, 0, 0]) / B
    pred_loss = jnp.sum(se_part[:, 0, 0]) / (B * P)
    # TODO(synk): decoder_loss term omitted (graph decoder not representable here).
    total = beta * kl + prop_weight * pred_loss

    return z_lat_p[:B, :L], pred_p[:B, :P], kl, pred_loss, total


def init_params(key, hidden, latent, num_props):
    ks = jax.random.split(key, 5)

    def lin(k, fan_in, fan_out):
        kw, kb = jax.random.split(k)
        scale = 1.0 / jnp.sqrt(fan_in)
        w = jax.random.uniform(kw, (fan_in, fan_out), jnp.float32, -scale, scale)
        b = jax.random.uniform(kb, (1, fan_out), jnp.float32, -scale, scale)
        return w, b

    w_mean, b_mean = lin(ks[0], hidden, latent)
    w_logvar, b_logvar = lin(ks[1], hidden, latent)
    w1, b1 = lin(ks[2], latent, hidden)
    w2, b2 = lin(ks[3], hidden, hidden)
    w3, b3 = lin(ks[4], hidden, num_props)
    return dict(w_mean=w_mean, b_mean=b_mean, w_logvar=w_logvar, b_logvar=b_logvar,
                w1=w1, b1=b1, w2=w2, b2=b2, w3=w3, b3=b3)


if __name__ == "__main__":
    B, HIDDEN, LATENT, NUM_PROPS = 20, 32, 16, 4   # B=20 with block_rows=8 -> 3 grid blocks, padded rows
    beta, prop_weight = 0.1, 0.5

    key = jax.random.PRNGKey(0)
    k_z, k_eps, k_props, k_params = jax.random.split(key, 4)

    z_enc = jax.random.normal(k_z, (B, HIDDEN), jnp.float32)     # encoder output (stand-in)
    eps = jax.random.normal(k_eps, (B, LATENT), jnp.float32)     # reparameterization noise
    props = jax.random.normal(k_props, (B, NUM_PROPS), jnp.float32)
    params = init_params(k_params, HIDDEN, LATENT, NUM_PROPS)

    run = functools.partial(micam_head, beta=beta, prop_weight=prop_weight, block_rows=8)
    z_lat, pred, kl, pred_loss, total = run(z_enc, eps, props, params)
    jax.block_until_ready((z_lat, pred, kl, pred_loss, total))

    # pure-JAX reference of the same math
    z_mean = z_enc @ params["w_mean"] + params["b_mean"]
    z_lv = jnp.minimum(z_enc @ params["w_logvar"] + params["b_logvar"], 10.0)
    kl_ref = -0.5 * jnp.sum(1.0 + z_lv - z_mean * z_mean - jnp.exp(z_lv)) / B
    z_ref = z_mean + jnp.exp(z_lv / 2.0) * eps
    h = jnp.maximum(z_ref @ params["w1"] + params["b1"], 0.0)
    h = jnp.maximum(h @ params["w2"] + params["b2"], 0.0)
    pred_ref = h @ params["w3"] + params["b3"]
    pl_ref = jnp.mean((pred_ref - props) ** 2)
    total_ref = beta * kl_ref + prop_weight * pl_ref

    assert jnp.allclose(z_lat, z_ref, atol=1e-4, rtol=1e-4)
    assert jnp.allclose(pred, pred_ref, atol=1e-4, rtol=1e-4)
    assert jnp.allclose(kl, kl_ref, atol=1e-3, rtol=1e-3)
    assert jnp.allclose(pred_loss, pl_ref, atol=1e-4, rtol=1e-4)
    assert jnp.allclose(total, total_ref, atol=1e-3, rtol=1e-3)

    # dev path (perturb=False) sanity check: z == z_mean
    z_dev, _, _, _, _ = micam_head(z_enc, eps, props, params, beta, prop_weight,
                                   block_rows=8, perturb=False)
    assert jnp.allclose(z_dev, z_mean, atol=1e-4, rtol=1e-4)

    print("KERNEL_OK")
</pallas_src>

<mosaic_0001>
module attributes {stable_mosaic.version = 11 : i64} {
  func.func @micam_head_kernel(%arg0: i32, %arg1: memref<1xi32, #tpu.memory_space<smem>>, %arg2: memref<8x128xf32, #tpu.memory_space<vmem>>, %arg3: memref<8x128xf32, #tpu.memory_space<vmem>>, %arg4: memref<8x128xf32, #tpu.memory_space<vmem>>, %arg5: memref<128x256xf32, #tpu.memory_space<vmem>>, %arg6: memref<1x256xf32, #tpu.memory_space<vmem>>, %arg7: memref<128x128xf32, #tpu.memory_space<vmem>>, %arg8: memref<1x128xf32, #tpu.memory_space<vmem>>, %arg9: memref<128x128xf32, #tpu.memory_space<vmem>>, %arg10: memref<1x128xf32, #tpu.memory_space<vmem>>, %arg11: memref<128x128xf32, #tpu.memory_space<vmem>>, %arg12: memref<1x128xf32, #tpu.memory_space<vmem>>, %arg13: memref<8x128xf32, #tpu.memory_space<vmem>>, %arg14: memref<8x128xf32, #tpu.memory_space<vmem>>, %arg15: memref<1x8x128xf32, #tpu.memory_space<vmem>>, %arg16: memref<1x8x128xf32, #tpu.memory_space<vmem>>) attributes {dimension_semantics = [#tpu.dimension_semantics<parallel>], iteration_bounds = array<i64: 3>, scalar_prefetch = 1 : i64, scratch_operands = 0 : i64, tpu.core_type = #tpu.core_type<tc>, window_params = [{transform_indices = @transform_0, window_bounds = array<i64: 8, 128>}, {transform_indices = @transform_1, window_bounds = array<i64: 8, 128>}, {transform_indices = @transform_2, window_bounds = array<i64: 8, 128>}, {pipeline_mode = #tpu.pipeline_mode<synchronous>, transform_indices = @transform_3, window_bounds = array<i64: 128, 256>}, {pipeline_mode = #tpu.pipeline_mode<synchronous>, transform_indices = @transform_4, window_bounds = array<i64: 1, 256>}, {pipeline_mode = #tpu.pipeline_mode<synchronous>, transform_indices = @transform_5, window_bounds = array<i64: 128, 128>}, {pipeline_mode = #tpu.pipeline_mode<synchronous>, transform_indices = @transform_6, window_bounds = array<i64: 1, 128>}, {pipeline_mode = #tpu.pipeline_mode<synchronous>, transform_indices = @transform_7, window_bounds = array<i64: 128, 128>}, {pipeline_mode = #tpu.pipeline_mode<synchronous>, transform_indices = @transform_8, window_bounds = array<i64: 1, 128>}, {pipeline_mode = #tpu.pipeline_mode<synchronous>, transform_indices = @transform_9, window_bounds = array<i64: 128, 128>}, {pipeline_mode = #tpu.pipeline_mode<synchronous>, transform_indices = @transform_10, window_bounds = array<i64: 1, 128>}, {transform_indices = @transform_11, window_bounds = array<i64: 8, 128>}, {transform_indices = @transform_12, window_bounds = array<i64: 8, 128>}, {transform_indices = @transform_13, window_bounds = array<i64: 1, 8, 128>}, {transform_indices = @transform_14, window_bounds = array<i64: 1, 8, 128>}]} {
    %c0 = arith.constant 0 : index
    %c0_0 = arith.constant 0 : index
    %0 = vector.load %arg2[%c0, %c0_0] : memref<8x128xf32, #tpu.memory_space<vmem>>, vector<8x128xf32>
    %c0_1 = arith.constant 0 : index
    %c0_2 = arith.constant 0 : index
    %1 = vector.load %arg5[%c0_1, %c0_2] : memref<128x256xf32, #tpu.memory_space<vmem>>, vector<128x256xf32>
    %cst = arith.constant dense<0.000000e+00> : vector<8x256xf32>
    %2 = tpu.matmul %0, %1, %cst {dimension_numbers = #tpu.dot_dimension_numbers<[1], [0], [0], [1], [0, 0, 1, 1], [], []>} : vector<8x128xf32>, vector<128x256xf32>, vector<8x256xf32> -> vector<8x256xf32>
    %c0_3 = arith.constant 0 : index
    %c0_4 = arith.constant 0 : index
    %3 = vector.load %arg6[%c0_3, %c0_4] : memref<1x256xf32, #tpu.memory_space<vmem>>, vector<1x256xf32>
    %4 = vector.broadcast %3 : vector<1x256xf32> to vector<8x256xf32>
    %5 = arith.addf %2, %4 : vector<8x256xf32>
    %6 = vector.extract_strided_slice %5 {offsets = [0, 0], sizes = [8, 128], strides = [1, 1]} : vector<8x256xf32> to vector<8x128xf32>
    %7 = vector.extract_strided_slice %5 {offsets = [0, 128], sizes = [8, 128], strides = [1, 1]} : vector<8x256xf32> to vector<8x128xf32>
    %cst_5 = arith.constant 1.000000e+01 : f32
    %8 = vector.broadcast %cst_5 : f32 to vector<8x128xf32>
    %9 = arith.minimumf %7, %8 : vector<8x128xf32>
    %cst_6 = arith.constant 5.000000e-01 : f32
    %10 = vector.broadcast %cst_6 : f32 to vector<8x128xf32>
    %11 = arith.mulf %10, %9 : vector<8x128xf32>
    %12 = math.exp %11 : vector<8x128xf32>
    %c0_7 = arith.constant 0 : index
    %c0_8 = arith.constant 0 : index
    %13 = vector.load %arg3[%c0_7, %c0_8] : memref<8x128xf32, #tpu.memory_space<vmem>>, vector<8x128xf32>
    %14 = arith.mulf %12, %13 : vector<8x128xf32>
    %15 = arith.addf %6, %14 : vector<8x128xf32>
    %c0_9 = arith.constant 0 : index
    %c0_10 = arith.constant 0 : index
    %16 = vector.load %arg13[%c0_9, %c0_10] : memref<8x128xf32, #tpu.memory_space<vmem>>, vector<8x128xf32>
    tpu.vector_store %arg13[%c0_9, %c0_10], %15 {strides = array<i32>} : memref<8x128xf32, #tpu.memory_space<vmem>>, vector<8x128xf32>,
    %17 = tpu.iota {dimensions = array<i32: 0>} : vector<8x1xi32>
    %c8_i32 = arith.constant 8 : i32
    %18 = arith.muli %arg0, %c8_i32 : i32
    %19 = vector.broadcast %18 : i32 to vector<8x1xi32>
    %20 = arith.addi %17, %19 : vector<8x1xi32>
    %c0_11 = arith.constant 0 : index
    %21 = memref.load %arg1[%c0_11] : memref<1xi32, #tpu.memory_space<smem>>
    %22 = vector.broadcast %21 : i32 to vector<8x1xi32>
    %23 = arith.cmpi slt, %20, %22 : vector<8x1xi32>
    %24 = arith.extui %23 : vector<8x1xi1> to vector<8x1xi32>
    %25 = arith.sitofp %24 : vector<8x1xi32> to vector<8x1xf32>
    %cst_12 = arith.constant 1.000000e+00 : f32
    %26 = vector.broadcast %cst_12 : f32 to vector<8x128xf32>
    %27 = arith.addf %26, %9 : vector<8x128xf32>
    %28 = arith.mulf %6, %6 : vector<8x128xf32>
    %29 = arith.subf %27, %28 : vector<8x128xf32>
    %30 = arith.mulf %12, %12 : vector<8x128xf32>
    %31 = arith.subf %29, %30 : vector<8x128xf32>
    %32 = vector.broadcast %25 : vector<8x1xf32> to vector<8x128xf32>
    %33 = arith.mulf %31, %32 : vector<8x128xf32>
    %34 = vector.shape_cast %33 : vector<8x128xf32> to vector<1x8x128xf32>
    %cst_13 = arith.constant dense<0.000000e+00> : vector<1xf32>
    %35 = vector.multi_reduction <add>, %34, %cst_13 [1, 2] : vector<1x8x128xf32> to vector<1xf32>
    %36 = vector.shape_cast %35 : vector<1xf32> to vector<1x1x1xf32>
    %37 = vector.extract %36[0, 0, 0] : f32 from vector<1x1x1xf32>
    %cst_14 = arith.constant -5.000000e-01 : f32
    %38 = arith.mulf %cst_14, %37 : f32
    %c0_15 = arith.constant 0 : index
    %c0_16 = arith.constant 0 : index
    %39 = vector.load %arg7[%c0_15, %c0_16] : memref<128x128xf32, #tpu.memory_space<vmem>>, vector<128x128xf32>
    %cst_17 = arith.constant dense<0.000000e+00> : vector<8x128xf32>
    %40 = tpu.matmul %15, %39, %cst_17 {dimension_numbers = #tpu.dot_dimension_numbers<[1], [0], [0], [1], [0, 0, 1, 1], [], []>} : vector<8x128xf32>, vector<128x128xf32>, vector<8x128xf32> -> vector<8x128xf32>
    %c0_18 = arith.constant 0 : index
    %c0_19 = arith.constant 0 : index
    %41 = vector.load %arg8[%c0_18, %c0_19] : memref<1x128xf32, #tpu.memory_space<vmem>>, vector<1x128xf32>
    %42 = vector.broadcast %41 : vector<1x128xf32> to vector<8x128xf32>
    %43 = arith.addf %40, %42 : vector<8x128xf32>
    %cst_20 = arith.constant 0.000000e+00 : f32
    %44 = vector.broadcast %cst_20 : f32 to vector<8x128xf32>
    %45 = arith.maximumf %43, %44 : vector<8x128xf32>
    %c0_21 = arith.constant 0 : index
    %c0_22 = arith.constant 0 : index
    %46 = vector.load %arg9[%c0_21, %c0_22] : memref<128x128xf32, #tpu.memory_space<vmem>>, vector<128x128xf32>
    %cst_23 = arith.constant dense<0.000000e+00> : vector<8x128xf32>
    %47 = tpu.matmul %45, %46, %cst_23 {dimension_numbers = #tpu.dot_dimension_numbers<[1], [0], [0], [1], [0, 0, 1, 1], [], []>} : vector<8x128xf32>, vector<128x128xf32>, vector<8x128xf32> -> vector<8x128xf32>
    %c0_24 = arith.constant 0 : index
    %c0_25 = arith.constant 0 : index
    %48 = vector.load %arg10[%c0_24, %c0_25] : memref<1x128xf32, #tpu.memory_space<vmem>>, vector<1x128xf32>
    %49 = vector.broadcast %48 : vector<1x128xf32> to vector<8x128xf32>
    %50 = arith.addf %47, %49 : vector<8x128xf32>
    %cst_26 = arith.constant 0.000000e+00 : f32
    %51 = vector.broadcast %cst_26 : f32 to vector<8x128xf32>
    %52 = arith.maximumf %50, %51 : vector<8x128xf32>
    %c0_27 = arith.constant 0 : index
    %c0_28 = arith.constant 0 : index
    %53 = vector.load %arg11[%c0_27, %c0_28] : memref<128x128xf32, #tpu.memory_space<vmem>>, vector<128x128xf32>
    %cst_29 = arith.constant dense<0.000000e+00> : vector<8x128xf32>
    %54 = tpu.matmul %52, %53, %cst_29 {dimension_numbers = #tpu.dot_dimension_numbers<[1], [0], [0], [1], [0, 0, 1, 1], [], []>} : vector<8x128xf32>, vector<128x128xf32>, vector<8x128xf32> -> vector<8x128xf32>
    %c0_30 = arith.constant 0 : index
    %c0_31 = arith.constant 0 : index
    %55 = vector.load %arg12[%c0_30, %c0_31] : memref<1x128xf32, #tpu.memory_space<vmem>>, vector<1x128xf32>
    %56 = vector.broadcast %55 : vector<1x128xf32> to vector<8x128xf32>
    %57 = arith.addf %54, %56 : vector<8x128xf32>
    %c0_32 = arith.constant 0 : index
    %c0_33 = arith.constant 0 : index
    %58 = vector.load %arg14[%c0_32, %c0_33] : memref<8x128xf32, #tpu.memory_space<vmem>>, vector<8x128xf32>
    tpu.vector_store %arg14[%c0_32, %c0_33], %57 {strides = array<i32>} : memref<8x128xf32, #tpu.memory_space<vmem>>, vector<8x128xf32>,
    %c0_34 = arith.constant 0 : index
    %c0_35 = arith.constant 0 : index
    %59 = vector.load %arg4[%c0_34, %c0_35] : memref<8x128xf32, #tpu.memory_space<vmem>>, vector<8x128xf32>
    %60 = arith.subf %57, %59 : vector<8x128xf32>
    %61 = vector.broadcast %25 : vector<8x1xf32> to vector<8x128xf32>
    %62 = arith.mulf %60, %61 : vector<8x128xf32>
    %63 = arith.mulf %62, %62 : vector<8x128xf32>
    %64 = vector.shape_cast %63 : vector<8x128xf32> to vector<1x8x128xf32>
    %cst_36 = arith.constant dense<0.000000e+00> : vector<1xf32>
    %65 = vector.multi_reduction <add>, %64, %cst_36 [1, 2] : vector<1x8x128xf32> to vector<1xf32>
    %66 = vector.shape_cast %65 : vector<1xf32> to vector<1x1x1xf32>
    %67 = vector.extract %66[0, 0, 0] : f32 from vector<1x1x1xf32>
    %68 = vector.broadcast %38 : f32 to vector<1x8x128xf32>
    %c0_37 = arith.constant 0 : index
    %c0_38 = arith.constant 0 : index
    %c0_39 = arith.constant 0 : index
    %69 = vector.load %arg15[%c0_37, %c0_38, %c0_39] : memref<1x8x128xf32, #tpu.memory_space<vmem>>, vector<1x8x128xf32>
    tpu.vector_store %arg15[%c0_37, %c0_38, %c0_39], %68 {strides = array<i32>} : memref<1x8x128xf32, #tpu.memory_space<vmem>>, vector<1x8x128xf32>,
    %70 = vector.broadcast %67 : f32 to vector<1x8x128xf32>
    %c0_40 = arith.constant 0 : index
    %c0_41 = arith.constant 0 : index
    %c0_42 = arith.constant 0 : index
    %71 = vector.load %arg16[%c0_40, %c0_41, %c0_42] : memref<1x8x128xf32, #tpu.memory_space<vmem>>, vector<1x8x128xf32>
    tpu.vector_store %arg16[%c0_40, %c0_41, %c0_42], %70 {strides = array<i32>} : memref<1x8x128xf32, #tpu.memory_space<vmem>>, vector<1x8x128xf32>,
    return
  }
  func.func @transform_0(%arg0: i32, %arg1: memref<1xi32, #tpu.memory_space<smem>>) -> (i32, i32) {
    %c0_i32 = arith.constant 0 : i32
    %c0_i32_0 = arith.constant 0 : i32
    return %arg0, %c0_i32 : i32, i32
  }
  func.func @transform_1(%arg0: i32, %arg1: memref<1xi32, #tpu.memory_space<smem>>) -> (i32, i32) {
    %c0_i32 = arith.constant 0 : i32
    %c0_i32_0 = arith.constant 0 : i32
    return %arg0, %c0_i32 : i32, i32
  }
  func.func @transform_2(%arg0: i32, %arg1: memref<1xi32, #tpu.memory_space<smem>>) -> (i32, i32) {
    %c0_i32 = arith.constant 0 : i32
    %c0_i32_0 = arith.constant 0 : i32
    return %arg0, %c0_i32 : i32, i32
  }
  func.func @transform_3(%arg0: i32, %arg1: memref<1xi32, #tpu.memory_space<smem>>) -> (i32, i32) {
    %c0_i32 = arith.constant 0 : i32
    %c0_i32_0 = arith.constant 0 : i32
    %c0_i32_1 = arith.constant 0 : i32
    return %c0_i32, %c0_i32_0 : i32, i32
  }
  func.func @transform_4(%arg0: i32, %arg1: memref<1xi32, #tpu.memory_space<smem>>) -> (i32, i32) {
    %c0_i32 = arith.constant 0 : i32
    %c0_i32_0 = arith.constant 0 : i32
    %c0_i32_1 = arith.constant 0 : i32
    return %c0_i32, %c0_i32_0 : i32, i32
  }
  func.func @transform_5(%arg0: i32, %arg1: memref<1xi32, #tpu.memory_space<smem>>) -> (i32, i32) {
    %c0_i32 = arith.constant 0 : i32
    %c0_i32_0 = arith.constant 0 : i32
    %c0_i32_1 = arith.constant 0 : i32
    return %c0_i32, %c0_i32_0 : i32, i32
  }
  func.func @transform_6(%arg0: i32, %arg1: memref<1xi32, #tpu.memory_space<smem>>) -> (i32, i32) {
    %c0_i32 = arith.constant 0 : i32
    %c0_i32_0 = arith.constant 0 : i32
    %c0_i32_1 = arith.constant 0 : i32
    return %c0_i32, %c0_i32_0 : i32, i32
  }
  func.func @transform_7(%arg0: i32, %arg1: memref<1xi32, #tpu.memory_space<smem>>) -> (i32, i32) {
    %c0_i32 = arith.constant 0 : i32
    %c0_i32_0 = arith.constant 0 : i32
    %c0_i32_1 = arith.constant 0 : i32
    return %c0_i32, %c0_i32_0 : i32, i32
  }
  func.func @transform_8(%arg0: i32, %arg1: memref<1xi32, #tpu.memory_space<smem>>) -> (i32, i32) {
    %c0_i32 = arith.constant 0 : i32
    %c0_i32_0 = arith.constant 0 : i32
    %c0_i32_1 = arith.constant 0 : i32
    return %c0_i32, %c0_i32_0 : i32, i32
  }
  func.func @transform_9(%arg0: i32, %arg1: memref<1xi32, #tpu.memory_space<smem>>) -> (i32, i32) {
    %c0_i32 = arith.constant 0 : i32
    %c0_i32_0 = arith.constant 0 : i32
    %c0_i32_1 = arith.constant 0 : i32
    return %c0_i32, %c0_i32_0 : i32, i32
  }
  func.func @transform_10(%arg0: i32, %arg1: memref<1xi32, #tpu.memory_space<smem>>) -> (i32, i32) {
    %c0_i32 = arith.constant 0 : i32
    %c0_i32_0 = arith.constant 0 : i32
    %c0_i32_1 = arith.constant 0 : i32
    return %c0_i32, %c0_i32_0 : i32, i32
  }
  func.func @transform_11(%arg0: i32, %arg1: memref<1xi32, #tpu.memory_space<smem>>) -> (i32, i32) {
    %c0_i32 = arith.constant 0 : i32
    %c0_i32_0 = arith.constant 0 : i32
    return %arg0, %c0_i32 : i32, i32
  }
  func.func @transform_12(%arg0: i32, %arg1: memref<1xi32, #tpu.memory_space<smem>>) -> (i32, i32) {
    %c0_i32 = arith.constant 0 : i32
    %c0_i32_0 = arith.constant 0 : i32
    return %arg0, %c0_i32 : i32, i32
  }
  func.func @transform_13(%arg0: i32, %arg1: memref<1xi32, #tpu.memory_space<smem>>) -> (i32, i32, i32) {
    %c0_i32 = arith.constant 0 : i32
    %c0_i32_0 = arith.constant 0 : i32
    %c0_i32_1 = arith.constant 0 : i32
    return %arg0, %c0_i32, %c0_i32_0 : i32, i32, i32
  }
  func.func @transform_14(%arg0: i32, %arg1: memref<1xi32, #tpu.memory_space<smem>>) -> (i32, i32, i32) {
    %c0_i32 = arith.constant 0 : i32
    %c0_i32_0 = arith.constant 0 : i32
    %c0_i32_1 = arith.constant 0 : i32
    return %arg0, %c0_i32, %c0_i32_0 : i32, i32, i32
  }
}

</mosaic_0001>

<bundles_post_ra>
// kernel: tpu_custom_call.1
= control target key start
LH: loop header
LB: loop body
LE: loop exit
PB: predicated region body
PF: predicated region fallthrough
CT: control target
= control target key end

     0   :  { %s2815_s0 = inlined_call_operand.<no memory space> [shape: s32[1], index: 0, kind: input, shape index: {}]   ;;  %s2816_s1 = inlined_call_operand.hbm [shape: f32[24,128], index: 1, kind: input, shape index: {}]   ;;  %s2817_s2 = inlined_call_operand.hbm [shape: f32[24,128], index: 2, kind: input, shape index: {}]   ;;  %s2818_s3 = inlined_call_operand.hbm [shape: f32[24,128], index: 3, kind: input, shape index: {}]   ;;  %s2819_s4 = inlined_call_operand.hbm [shape: f32[128,256], index: 4, kind: input, shape index: {}]   ;;  %s2820_s5 = inlined_call_operand.vmem [shape: f32[1,256], index: 5, kind: input, shape index: {}]   ;;  %s2821_s6 = inlined_call_operand.hbm [shape: f32[128,128], index: 6, kind: input, shape index: {}]   ;;  %s2822_s7 = inlined_call_operand.vmem [shape: f32[1,128], index: 7, kind: input, shape index: {}]   ;;  %s2823_s8 = inlined_call_operand.hbm [shape: f32[128,128], index: 8, kind: input, shape index: {}]   ;;  %s2824_s9 = inlined_call_operand.vmem [shape: f32[1,128], index: 9, kind: input, shape index: {}]   ;;  %s2825_s10 = inlined_call_operand.hbm [shape: f32[128,128], index: 10, kind: input, shape index: {}]   ;;  %s2826_s11 = inlined_call_operand.vmem [shape: f32[1,128], index: 11, kind: input, shape index: {}]   ;;  %s2827_s12 = inlined_call_operand.hbm [shape: f32[24,128], index: 12, kind: output, shape index: {0}]   ;;  %s2828_s13 = inlined_call_operand.hbm [shape: f32[24,128], index: 13, kind: output, shape index: {1}]   ;;  %s2829_s14 = inlined_call_operand.hbm [shape: f32[3,8,128], index: 14, kind: output, shape index: {2}]   ;;  %s2830_s15 = inlined_call_operand.hbm [shape: f32[3,8,128], index: 15, kind: output, shape index: {3}]  }
   0x1   :  { %2861 = sst [smem:[#allocation35_spill]] %s2817_s2 }
   0x2   :  { %2862 = sst [smem:[#allocation36_spill]] %s2819_s4 }
   0x3   :  { %2863 = sst [smem:[#allocation37_spill]] %s2822_s7 }
   0x4   :  { %2864 = sst [smem:[#allocation38_spill]] %s2823_s8 }
   0x5   :  { %2865 = sst [smem:[#allocation39_spill]] %s2824_s9 }
   0x6   :  { %2866 = sst [smem:[#allocation40_spill]] %s2826_s11 }
   0x7   :  { %2867 = sst [smem:[#allocation41_spill]] %s2827_s12 }
   0x8   :  { %2868 = sst [smem:[#allocation42_spill]] %s2828_s13 }
   0x9   :  { %2869 = sst [smem:[#allocation43_spill]] %s2829_s14 }
   0xa   :  { %2870 = sst [smem:[#allocation44_spill]] %s2830_s15 }
   0xb   :  { %21 = sst [smem:[#allocation3]] %s2815_s0 }
   0xc   :  { %22 = vsyncpa [#allocation5], 0 }
   0xd   :  { %24 = vsyncpa [#allocation5 + $0x1], 0 }
   0xe   :  { %25 = vsyncpa [#allocation8], 0 }
   0xf   :  { %27 = vsyncpa [#allocation8 + $0x1], 0 }
  0x10   :  { %28 = vsyncpa [#allocation11], 0 }
  0x11   :  { %29 = vsyncpa [#allocation14], 0 }
  0x12   :  { %30 = vsyncpa [#allocation6], 0 }
  0x13   :  { %32 = vsyncpa [#allocation6 + $0x1], 0 }
  0x14   :  { %33 = vsyncpa [#allocation18], 0 }
  0x15   :  { %35 = vsyncpa [#allocation18 + $0x1], 0 }
  0x16   :  { %36 = vsyncpa [#allocation21], 0 }
  0x17   :  { %38 = vsyncpa [#allocation21 + $0x1], 0  ;;  %s2303_s20 = smov 0   ;;  %s2305_s21 = smov 0  }
  0x18   :  { %s2307_s22 = smov 0   ;;  %s2309_s23 = smov 0  }
  0x19 LB: > { %2871 = sst [smem:[#allocation29_spill]] %s2188_s20  ;;  %s2202_s0 = smov [#allocation10]   ;;  %s2200_s23 = sphi %s2309_s23, %s2916_s23   ;;  %s2196_s22 = sphi %s2307_s22, %s2920_s22   ;;  %s2192_s21 = sphi %s2305_s21, %s2919_s21   ;;  %s2188_s20 = sphi %s2303_s20, %s2918_s20  }
  0x1a   : > { %2872 = sst [smem:[#allocation30_spill]] %s2200_s23  ;;  %s411_s24 = sshll.u32 %s2202_s0, 4  ;;  %s2329_s24 = int_to_ptr.vmem [resolvable:$true] %s411_s24 }
  0x1b   : > { %s2324_s25 = sadd.s32 4294967295, %s2200_s23   ;;  %p1404_p0 = scmp.ge.s32.totalorder %s2200_s23, 1 }
  0x1c   : > { %p2848_p1 = scmp.eq.s32.totalorder %s2324_s25, 0  ;;  %p399_p2 = scmp.lt.s32.totalorder %s2200_s23, 4 }
  0x1d   : > { %s2203_s28 = smov [#allocation13]   ;;  %s2875_s4 = sld [smem:[#allocation36_spill]] }
  0x1e   : > { %p2331_p3 = pnand %p1404_p0, %p399_p2  ;;  %s443_s29 = sshll.u32 %s2203_s28, 4  ;;  %s2343_s29 = int_to_ptr.vmem [resolvable:$true] %s443_s29 }
  0x20   : > { %s2873_s26 = scalar_select %p2331_p3, 1, 0 }
  0x21   : > { %p1737_p4 = pneg %p2331_p3 }
  0x23   : > { %p2339_p5 = pnand %p1737_p4, %p2848_p1  ;;  %s1828_s17 = scalar_lea.hbm %s2875_s4, 4096 }
  0x24   : > { %p1829_p6 = scmp.ne.s32.totalorder %s2875_s4, %s1828_s17  ;;  %p1835_p10 = scmp.lt.u32.totalorder %s1828_s17, %s2875_s4 }
  0x25   : > { %s2874_s27 = scalar_select %p2339_p5, 1, 0 }
  0x26   : > { %p2353_p7 = pneg %p2339_p5 }
  0x28   : > { %s2876_s0 = scalar_select %p2353_p7, 1, 0 }
  0x29   : > { %p1831_p8 = pnand %p2353_p7, %p1829_p6 }
  0x2b   : > { %p1832_p9 = pneg %p1831_p8 }
  0x2d   : > { %p1837_p11 = pnand %p1835_p10, %p1832_p9 }
  0x2f   : > { %1840 = shalt.err (!%p1837_p11)
}
  0x30   : > { %s1841_s30 = scalar_lea.vmem %s2329_s24, 4096  ;;  %p1849_p2 = scmp.lt.s32.totalorder %s2329_s24, %s2329_s24 }
  0x31   : > { %p1842_p12 = scmp.ne.s32.totalorder %s2329_s24, %s1841_s30  ;;  %p1850_p4 = scmp.lt.s32.totalorder %s1841_s30, %s1841_s30 }
  0x33   : > { %p1844_p13 = pnand %p1842_p12, %p2353_p7  ;;  %p1851_p6 = por %p1850_p4, %p1849_p2 }
  0x35   : > { %p1845_p0 = pneg %p1844_p13 }
  0x37   : > { %p1852_p8 = pnand %p1851_p6, %p1845_p0 }
  0x39   : > { %1855 = shalt.err (!%p1852_p8)
}
  0x3a   : > { %s2204_s16 = smov 256   ;;  %s2205_s15 = smov 16  }
  0x3b   : > { %1740 = dma.hbm_to_vmem [thread:$0]  (!%p2339_p5), %s2875_s4, 4096, %s2329_s24, [#allocation11], %s2204_s16, %s2204_s16, %s2205_s15  }
  0x3c   : > { %s2877_s8 = sld [smem:[#allocation38_spill]] }
  0x42   : > { %s1856_s14 = scalar_lea.hbm %s2877_s8, 2048 }
  0x43   : > { %p1857_p9 = scmp.ne.s32.totalorder %s2877_s8, %s1856_s14  ;;  %p1863_p12 = scmp.lt.u32.totalorder %s1856_s14, %s2877_s8 }
  0x45   : > { %p1859_p10 = pnand %p1857_p9, %p2353_p7 }
  0x47   : > { %p1860_p11 = pneg %p1859_p10 }
  0x49   : > { %p1865_p13 = pnand %p1863_p12, %p1860_p11 }
  0x4b   : > { %1868 = shalt.err (!%p1865_p13)
}
  0x4c   : > { %s1869_s24 = scalar_lea.vmem %s2343_s29, 2048  ;;  %p1877_p6 = scmp.lt.s32.totalorder %s2343_s29, %s2343_s29 }
  0x4d   : > { %p1870_p0 = scmp.ne.s32.totalorder %s2343_s29, %s1869_s24  ;;  %p1878_p8 = scmp.lt.s32.totalorder %s1869_s24, %s1869_s24 }
  0x4f   : > { %p1872_p2 = pnand %p1870_p0, %p2353_p7  ;;  %p1879_p9 = por %p1878_p8, %p1877_p6 }
  0x51   : > { %p1873_p4 = pneg %p1872_p2 }
  0x53   : > { %p1880_p10 = pnand %p1879_p9, %p1873_p4 }
  0x55   : > { %1883 = shalt.err (!%p1880_p10)
}
  0x56   : > { %s2837_s12 = smov 128   ;;  %s2839_s11 = smov 8  }
  0x57   : > { %1746 = dma.hbm_to_vmem [thread:$0]  (!%p2339_p5), %s2877_s8, 2048, %s2343_s29, [#allocation14], %s2837_s12, %s2837_s12, %s2839_s11  }
  0x58   : > { %s2836_s16 = sadd.s32 4294967294, %s2200_s23   ;;  %s2402_s15 = sadd.s32 1, %s2200_s23  }
  0x59   : > { %2878 = sst [smem:[#allocation31_spill]] %s2402_s15  ;;  %s48_s17 = ssub.s32 %s2200_s23, %s2402_s15 }
  0x5a   : > { %s51_s18 = sadd.s32 1, %s2196_s22  ;;  %p49_p11 = scmp.eq.s32.totalorder %s48_s17, 0 }
  0x5b   : > { %p58_p12 = scmp.ne.s32.totalorder %s2196_s22, %s2192_s21  ;;  %p59_p13 = scmp.eq.s32.totalorder %s2200_s23, 0 }
  0x5c   : > { %p64_p0 = scmp.ne.s32.totalorder %s2192_s21, %s2188_s20  ;;  %p308_p6 = scmp.eq.s32.totalorder %s2324_s25, 2 }
  0x5d   : > { %s2413_s19 = scalar_select %p49_p11, %s2196_s22, %s51_s18  }
  0x5e   : > { %p60_p2 = por %p59_p13, %p58_p12  ;;  %p2417_p4 = por %p2848_p1, %p64_p0 }
  0x5f   : > { %2879 = sst [smem:[#allocation32_spill]] %s2413_s19  ;;  %p314_p8 = scmp.eq.s32.totalorder %s2836_s16, 2 }
  0x60   : > { %s2880_s28 = scalar_select %p2417_p4, 1, 0 }
  0x61   : > { %p1777_p9 = scmp.lt.s32.totalorder %s2200_s23, 3  ;;  %s2841_s29 = sand.u32 1, %s2196_s22  }
  0x62   : > { %p2426_p10 = por %p308_p6, %p58_p12  ;;  %p2430_p3 = por %p314_p8, %p64_p0 }
  0x63   : > { %s2436_s13 = sshll.u32 %s2841_s29, 3  ;;  %s2439_s14 = sshll.u32 %s2200_s23, 7 }
  0x64   : > { %s2881_s30 = scalar_select %p2426_p10, 1, 0 }
  0x65   : > { %s2883_s24 = scalar_select %p2430_p3, 1, 0 }
  0x66   : > { %2882 = sst [smem:[#allocation33_spill]] %s2881_s30  ;;  %p2441_p11 = pnand %p1777_p9, %p60_p2 }
  0x67   : > { %2884 = sst [smem:[#allocation34_spill]] %s2883_s24  ;;  %s494_s18 = sand.u32 1, %s2200_s23  }
  0x68   : > { %s2885_s17 = scalar_select %p2441_p11, 1, 0 }
  0x69   : > { %s2886_s2 = sld [smem:[#allocation35_spill]]  ;;  %s498_s29 = scalar_lea.vmem [#allocation7], %s2436_s13 }
  0x6a   : > { %s505_s4 = sshll.u32 %s498_s29, 4  ;;  %s2208_s8 = smov [#allocation12]   ;;  %s2453_s4 = int_to_ptr.vmem [resolvable:$true] %s505_s4 }
  0x6b   : > { %s2455_s19 = sshll.u32 %s2208_s8, 4  ;;  %s2457_s15 = scalar_lea.sflag [#allocation8], %s494_s18  ;;  %s428_s19 = int_to_ptr.vmem [resolvable:$true] %s2455_s19 }
  0x6c   : > { %p2463_p13 = pneg %p2441_p11 }
  0x6e   : > { %s2887_s12 = scalar_select %p2463_p13, 1, 0 }
  0x6f   : > { %s2450_s11 = scalar_lea.hbm %s2886_s2, %s2439_s14  ;;  %s1889_s20 = scalar_lea.hbm %s2886_s2, 384 }
  0x70   : > { %s1884_s24 = scalar_lea.hbm %s2450_s11, 128  ;;  %p1890_p6 = scmp.lt.u32.totalorder %s2450_s11, %s2886_s2 }
  0x71   : > { %p1885_p12 = scmp.ne.s32.totalorder %s2450_s11, %s1884_s24  ;;  %p1891_p8 = scmp.lt.u32.totalorder %s1889_s20, %s1884_s24 }
  0x72   : > { %p1893_p1 = scmp.lt.u32.totalorder %s1884_s24, %s2450_s11 }
  0x73   : > { %p1887_p0 = pnand %p2463_p13, %p1885_p12  ;;  %p1892_p9 = por %p1891_p8, %p1890_p6 }
  0x75   : > { %p1888_p2 = pneg %p1887_p0  ;;  %p1894_p3 = por %p1893_p1, %p1892_p9 }
  0x77   : > { %p1895_p10 = pnand %p1894_p3, %p1888_p2 }
  0x79   : > { %1898 = shalt.err (!%p1895_p10)
}
  0x7a   : > { %s1899_s18 = scalar_lea.vmem %s2453_s4, 128  ;;  %s2209_s16 = smov [#allocation7]  }
  0x7b   : > { %p1900_p12 = scmp.ne.s32.totalorder %s2453_s4, %s1899_s18  ;;  %s1904_s29 = sshll.u32 %s2209_s16, 4  ;;  %s1905_s29 = int_to_ptr.vmem [resolvable:$false] %s1904_s29 }
  0x7c   : > { %s1906_s23 = scalar_lea.vmem %s1905_s29, 256  ;;  %p1907_p5 = scmp.lt.s32.totalorder %s2453_s4, %s1905_s29 }
  0x7d   : > { %p1902_p0 = pnand %p1900_p12, %p2463_p13  ;;  %p1908_p7 = scmp.lt.s32.totalorder %s1906_s23, %s1899_s18 }
  0x7f   : > { %p1903_p4 = pneg %p1902_p0  ;;  %p1909_p6 = por %p1908_p7, %p1907_p5 }
  0x81   : > { %p1910_p8 = pnand %p1909_p6, %p1903_p4 }
  0x83   : > { %1913 = shalt.err (!%p1910_p8)
}
  0x84   : > { %1756 = dma.hbm_to_vmem [thread:$0]  (!%p2441_p11), %s2450_s11, 128, %s2453_s4, %s2457_s15  }
  0x85   : > { %s1914_s8 = scalar_lea.hbm %s2821_s6, 2048  ;;  %p2888_p3 = scmp.ne.s32.totalorder %s2876_s0, 0 }
  0x86   : > { %p1915_p1 = scmp.ne.s32.totalorder %s2821_s6, %s1914_s8  ;;  %p1921_p4 = scmp.lt.u32.totalorder %s1914_s8, %s2821_s6 }
  0x88   : > { %p1917_p5 = pnand %p1915_p1, %p2888_p3 }
  0x8a   : > { %p1918_p7 = pneg %p1917_p5 }
  0x8c   : > { %p1923_p10 = pnand %p1921_p4, %p1918_p7 }
  0x8e   : > { %1926 = shalt.err (!%p1923_p10)
}
  0x8f   : > { %s1927_s23 = scalar_lea.vmem %s428_s19, 2048  ;;  %p1935_p0 = scmp.lt.s32.totalorder %s428_s19, %s428_s19 }
  0x90   : > { %p1928_p2 = scmp.ne.s32.totalorder %s428_s19, %s1927_s23  ;;  %p1936_p6 = scmp.lt.s32.totalorder %s1927_s23, %s1927_s23 }
  0x92   : > { %p1930_p9 = pnand %p1928_p2, %p2888_p3  ;;  %p1937_p8 = por %p1936_p6, %p1935_p0 }
  0x94   : > { %p1931_p12 = pneg %p1930_p9 }
  0x96   : > { %p1938_p11 = pnand %p1937_p8, %p1931_p12 }
  0x98   : > { %1941 = shalt.err (!%p1938_p11)
}
  0x99   : > { %p2889_p1 = scmp.ne.s32.totalorder %s2874_s27, 0  ;;  %s2890_s2 = smov 8  }
  0x9a   : > { %s2891_s4 = smov 128   ;;  %s2210_s24 = smov [#allocation15]  }
  0x9b   : > { %1743 = dma.hbm_to_vmem [thread:$0]  (!%p2889_p1), %s2821_s6, 2048, %s428_s19, [#allocation11], %s2891_s4, %s2891_s4, %s2890_s2  }
  0x9c   : > { %s459_s8 = sshll.u32 %s2210_s24, 4  ;;  %s1942_s29 = scalar_lea.hbm %s2825_s10, 2048  ;;  %s460_s8 = int_to_ptr.vmem [resolvable:$true] %s459_s8 }
  0x9d   : > { %p1943_p11 = scmp.ne.s32.totalorder %s2825_s10, %s1942_s29  ;;  %p1949_p4 = scmp.lt.u32.totalorder %s1942_s29, %s2825_s10 }
  0x9f   : > { %p1945_p5 = pnand %p1943_p11, %p2888_p3 }
  0xa1   : > { %p1946_p7 = pneg %p1945_p5 }
  0xa3   : > { %p1951_p10 = pnand %p1949_p4, %p1946_p7 }
  0xa5   : > { %1954 = shalt.err (!%p1951_p10)
}
  0xa6   : > { %s1955_s19 = scalar_lea.vmem %s460_s8, 2048  ;;  %p1963_p0 = scmp.lt.s32.totalorder %s460_s8, %s460_s8 }
  0xa7   : > { %p1956_p2 = scmp.ne.s32.totalorder %s460_s8, %s1955_s19  ;;  %p1964_p6 = scmp.lt.s32.totalorder %s1955_s19, %s1955_s19 }
  0xa9   : > { %p1958_p9 = pnand %p1956_p2, %p2888_p3  ;;  %p1965_p8 = por %p1964_p6, %p1963_p0 }
  0xab   : > { %p1959_p12 = pneg %p1958_p9 }
  0xad   : > { %p1966_p13 = pnand %p1965_p8, %p1959_p12 }
  0xaf   : > { %1969 = shalt.err (!%p1966_p13)
}
  0xb0   : > { %1749 = dma.hbm_to_vmem [thread:$0]  (!%p2889_p1), %s2825_s10, 2048, %s460_s8, [#allocation14], %s2891_s4, %s2891_s4, %s2890_s2  }
  0xb1   : > { %s2534_s11 = scalar_lea.hbm %s2816_s1, %s2439_s14  ;;  %s480_s27 = scalar_lea.vmem [#allocation4], %s2436_s13 }
  0xb2   : > { %s487_s20 = sshll.u32 %s480_s27, 4  ;;  %s2892_s24 = sand.u32 1, %s2196_s22   ;;  %s488_s20 = int_to_ptr.vmem [resolvable:$true] %s487_s20 }
  0xb3   : > { %s477_s16 = scalar_lea.sflag [#allocation5], %s2892_s24  ;;  %s1970_s18 = scalar_lea.hbm %s2534_s11, 128 }
  0xb4   : > { %p1971_p13 = scmp.ne.s32.totalorder %s2534_s11, %s1970_s18  ;;  %p2893_p3 = scmp.ne.s32.totalorder %s2887_s12, 0 }
  0xb5   : > { %s1975_s8 = scalar_lea.hbm %s2816_s1, 384  ;;  %p1976_p1 = scmp.lt.u32.totalorder %s2534_s11, %s2816_s1 }
  0xb6   : > { %p1973_p11 = pnand %p1971_p13, %p2893_p3  ;;  %p1977_p7 = scmp.lt.u32.totalorder %s1975_s8, %s1970_s18 }
  0xb7   : > { %p1979_p10 = scmp.lt.u32.totalorder %s1970_s18, %s2534_s11 }
  0xb8   : > { %p1974_p5 = pneg %p1973_p11  ;;  %p1978_p4 = por %p1977_p7, %p1976_p1 }
  0xba   : > { %p1980_p2 = por %p1979_p10, %p1978_p4 }
  0xbc   : > { %p1981_p9 = pnand %p1980_p2, %p1974_p5 }
  0xbe   : > { %1984 = shalt.err (!%p1981_p9)
}
  0xbf   : > { %s1985_s19 = scalar_lea.vmem %s488_s20, 128  ;;  %s2211_s7 = smov [#allocation4]  }
  0xc0   : > { %p1986_p12 = scmp.ne.s32.totalorder %s488_s20, %s1985_s19  ;;  %s1990_s9 = sshll.u32 %s2211_s7, 4  ;;  %s1991_s9 = int_to_ptr.vmem [resolvable:$false] %s1990_s9 }
  0xc1   : > { %s1992_s0 = scalar_lea.vmem %s1991_s9, 256  ;;  %p1993_p8 = scmp.lt.s32.totalorder %s488_s20, %s1991_s9 }
  0xc2   : > { %p1988_p0 = pnand %p1986_p12, %p2893_p3  ;;  %p1994_p13 = scmp.lt.s32.totalorder %s1992_s0, %s1985_s19 }
  0xc4   : > { %p1989_p6 = pneg %p1988_p0  ;;  %p1995_p11 = por %p1994_p13, %p1993_p8 }
  0xc6   : > { %p1996_p1 = pnand %p1995_p11, %p1989_p6 }
  0xc8   : > { %1999 = shalt.err (!%p1996_p1)
}
  0xc9   : > { %p2894_p7 = scmp.ne.s32.totalorder %s2885_s17, 0  ;;  %s2560_s24 = scalar_lea.hbm %s2818_s3, %s2439_s14 }
  0xca   : > { %s516_s18 = scalar_lea.vmem [#allocation9], %s2436_s13  ;;  %s2000_s4 = scalar_lea.hbm %s2560_s24, 128 }
  0xcb   : > { %1753 = dma.hbm_to_vmem [thread:$0]  (!%p2894_p7), %s2534_s11, 128, %s488_s20, %s477_s16  }
  0xcc   : > { %s523_s2 = sshll.u32 %s516_s18, 4  ;;  %p2001_p5 = scmp.ne.s32.totalorder %s2560_s24, %s2000_s4  ;;  %s524_s2 = int_to_ptr.vmem [resolvable:$true] %s523_s2 }
  0xcd   : > { %s2005_s11 = scalar_lea.hbm %s2818_s3, 384  ;;  %p2006_p2 = scmp.lt.u32.totalorder %s2560_s24, %s2818_s3 }
  0xce   : > { %p2003_p4 = pnand %p2001_p5, %p2893_p3  ;;  %p2007_p9 = scmp.lt.u32.totalorder %s2005_s11, %s2000_s4 }
  0xcf   : > { %p2009_p0 = scmp.lt.u32.totalorder %s2000_s4, %s2560_s24 }
  0xd0   : > { %p2004_p10 = pneg %p2003_p4  ;;  %p2008_p12 = por %p2007_p9, %p2006_p2 }
  0xd2   : > { %p2010_p6 = por %p2009_p0, %p2008_p12 }
  0xd4   : > { %p2011_p8 = pnand %p2010_p6, %p2004_p10 }
  0xd6   : > { %2014 = shalt.err (!%p2011_p8)
}
  0xd7   : > { %s2015_s13 = scalar_lea.vmem %s524_s2, 128  ;;  %s2212_s14 = smov [#allocation9]  }
  0xd8   : > { %p2016_p13 = scmp.ne.s32.totalorder %s524_s2, %s2015_s13  ;;  %s2020_s23 = sshll.u32 %s2212_s14, 4  ;;  %s2021_s23 = int_to_ptr.vmem [resolvable:$false] %s2020_s23 }
  0xd9   : > { %s2022_s19 = scalar_lea.vmem %s2021_s23, 256  ;;  %p2023_p5 = scmp.lt.s32.totalorder %s524_s2, %s2021_s23 }
  0xda   : > { %p2018_p11 = pnand %p2016_p13, %p2893_p3  ;;  %p2024_p4 = scmp.lt.s32.totalorder %s2022_s19, %s2015_s13 }
  0xdc   : > { %p2019_p1 = pneg %p2018_p11  ;;  %p2025_p7 = por %p2024_p4, %p2023_p5 }
  0xde   : > { %p2026_p2 = pnand %p2025_p7, %p2019_p1 }
  0xe0   : > { %2029 = shalt.err (!%p2026_p2)
}
  0xe1   : > { %p2895_p9 = scmp.ne.s32.totalorder %s2885_s17, 0  ;;  %p2896_p10 = scmp.ne.s32.totalorder %s2873_s26, 0 }
  0xe2   : > { %s2584_s12 = sand.u32 (!%p2896_p10), 1, %s2192_s21   ;;  %p2897_p3 = scmp.ne.s32.totalorder (!%p2896_p10), %s2880_s28, 0 }
  0xe3   : > { %1759 = dma.hbm_to_vmem [thread:$0]  (!%p2895_p9), %s2560_s24, 128, %s524_s2, %s2457_s15  }
  0xe4   : > { %532 = sbr.rel (%p2896_p10) target bundleno = 1387 (0x56b), region = 64  ;;  %s2587_s7 = sshll.u32 (!%p2896_p10), %s2584_s12, 3 }
  0xe5   : > { %s535_s9 = scalar_lea.sflag (!%p2896_p10), [#allocation5], %s2584_s12  ;;  %s538_s0 = scalar_lea.vmem (!%p2896_p10), [#allocation4], %s2587_s7 }
  0xeb   : > { %2159 = dma.done.wait (%p2897_p3), %s535_s9, 128  }
  0xec   : > { %2161 = vsyncadd (%p2897_p3), %s535_s9, 4294967168  ;;  %s543_s26 = sand.u32 1, %s2324_s25   ;;  %s547_s17 = scalar_lea.vmem [#allocation7], %s2587_s7 }
  0xed   : > { %s544_s15 = scalar_lea.sflag [#allocation8], %s543_s26 }
  0xee   : > { %2163 = dma.done.wait (%p2897_p3), %s544_s15, 256  }
  0xef   : > { %2165 = vsyncadd (%p2897_p3), %s544_s15, 4294967040  ;;  %s556_s30 = scalar_lea.vmem [#allocation9], %s2587_s7  ;;  %p2898_p7 = scmp.eq.s32.totalorder %s2324_s25, 0 }
  0xf1   : > { %2167 = dma.done.wait (%p2898_p7), [#allocation11], 6144   ;;  %p2899_p12 = pmov %p2898_p7 }
  0xf2   : > { %p2900_p0 = pmov %p2898_p7 }
  0xf3   : > { %2169 = vsyncadd (%p2899_p12), [#allocation11], 4294961152 }
  0xf4   : > { %2171 = dma.done.wait (%p2900_p0), [#allocation14], 4096   ;;  %p2901_p6 = pmov %p2900_p0 }
  0xf5   : > { %v2213_v0 = vmov 0.0   ;;  %v2214_v1 = vmov 0.0|0.0   ;;  %v644_v2 = vld [vmem:[#allocation10 + $0x8] sm:$0xff]  ;;  %v646_v3 = vld [vmem:[#allocation10 + $0x18] sm:$0xff]  ;;  %v643_v4 = vld [vmem:[#allocation10] sm:$0xff]  ;;  %vm2215_vm0 = vmmov 0  }
  0xf6   : > { %2173 = vsyncadd (%p2901_p6), [#allocation14], 4294963200  ;;  %751 = vmatprep.mubr.f32.mxu0 %v2213_v0  ;;  %1631 = vmatprep.subr.bf16.mxu1 %v2214_v1  ;;  %v1599_v5 = vpack.c.bf16 %v646_v3, %v644_v2  ;;  %v645_v6 = vld [vmem:[#allocation10 + $0x10] sm:$0xff]  ;;  %v648_v7 = vld [vmem:[#allocation10 + $0x28] sm:$0xff]  ;;  %s771_s24 = sld [smem:[#allocation3]]  ;;  %s1428_s18 = sshll.u32 %s2324_s25, 3 }
  0xf7   : > { %v650_v8 = vld [vmem:[#allocation10 + $0x38] sm:$0xff]  ;;  %v1601_v9 = vpack.c.bf16 %v645_v6, %v643_v4  ;;  %v647_v11 = vld [vmem:[#allocation10 + $0x20] sm:$0xff]  ;;  %v649_v12 = vld [vmem:[#allocation10 + $0x30] sm:$0xff]  ;;  %1526 = vmatprep.mubr.msk.f32.mxu1 %vm2215_vm0, %v2213_v0  ;;  %s620_s2 = scalar_lea.vmem [#allocation16], %s2587_s7  ;;  %s634_s29 = scalar_lea.vmem [#allocation19], %s2587_s7 }
  0xf8   : > { %v1603_v10 = vpack.c.bf16 %v650_v8, %v648_v7  ;;  %v652_v13 = vld [vmem:[#allocation10 + $0x48] sm:$0xff]  ;;  %1600 = vmatprep.subr.bf16.mxu0 %v1599_v5  ;;  %v654_v14 = vld [vmem:[#allocation10 + $0x58] sm:$0xff]  ;;  %v1605_v15 = vpack.c.bf16 %v649_v12, %v647_v11  ;;  %v651_v17 = vld [vmem:[#allocation10 + $0x40] sm:$0xff]  ;;  %s2902_s16 = sld [smem:[#allocation37_spill]]  ;;  %s2903_s23 = sld [smem:[#allocation39_spill]] }
  0xf9   : > { %1602 = vmatpush1.bf16.msra.mxu0 %v1601_v9  ;;  %v1607_v16 = vpack.c.bf16 %v654_v14, %v652_v13  ;;  %v653_v18 = vld [vmem:[#allocation10 + $0x50] sm:$0xff]  ;;  %v656_v19 = vld [vmem:[#allocation10 + $0x68] sm:$0xff]  ;;  %v658_v20 = vld [vmem:[#allocation10 + $0x78] sm:$0xff]  ;;  %v677_v13 = vlaneseq  ;;  %s2905_s15 = sld [smem:[#allocation33_spill]]  ;;  %s1146_s28 = sshll.u32 %s634_s29, 4  ;;  %s2675_s28 = int_to_ptr.vmem [resolvable:$true] %s1146_s28 }
  0xfa   : > { %1604 = vmatprep.subr.bf16.mxu0 %v1603_v10  ;;  %v1609_v21 = vpack.c.bf16 %v653_v18, %v651_v17  ;;  %v1611_v22 = vpack.c.bf16 %v658_v20, %v656_v19  ;;  %v655_v23 = vld [vmem:[#allocation10 + $0x60] sm:$0xff]  ;;  %v657_v24 = vld [vmem:[#allocation10 + $0x70] sm:$0xff]  ;;  %v660_v25 = vld [vmem:[#allocation10 + $0x88] sm:$0xff]  ;;  %s2673_s27 = sshll.u32 %s2324_s25, 7  ;;  %s2685_s11 = scalar_lea.sflag [#allocation18], %s543_s26 }
  0xfb   : > { %v662_v26 = vld [vmem:[#allocation10 + $0x98] sm:$0xff]  ;;  %v792_v27 = vld [vmem:[#allocation12] sm:$0xff]  ;;  %v793_v28 = vld [vmem:[#allocation12 + $0x8] sm:$0xff]  ;;  %v1613_v30 = vpack.c.bf16 %v657_v24, %v655_v23  ;;  %v678_v14 = vshrl.u32 %v677_v13, 7 }
  0xfc   : > { %v794_v29 = vld [vmem:[#allocation12 + $0x10] sm:$0xff]  ;;  %v1632_v31 = vpack.c.bf16 %v793_v28, %v792_v27  ;;  %v795_v32 = vld [vmem:[#allocation12 + $0x18] sm:$0xff]  ;;  %v1615_v33 = vpack.c.bf16 %v662_v26, %v660_v25  ;;  %v659_v34 = vld [vmem:[#allocation10 + $0x80] sm:$0xff] }
  0xfd   : > { %1606 = vmatpush1.bf16.msra.mxu0 %v1605_v15  ;;  %v661_v35 = vld [vmem:[#allocation10 + $0x90] sm:$0xff]  ;;  %v664_v36 = vld [vmem:[#allocation10 + $0xa8] sm:$0xff]  ;;  %v666_v37 = vld [vmem:[#allocation10 + $0xb8] sm:$0xff]  ;;  %v1635_v38 = vpack.c.bf16 %v795_v32, %v794_v29  ;;  %v679_v15 = vsub.s32 0, %v678_v14  ;;  %v772_v32 = vstv %s771_s24 }
  0xfe   : > { %1608 = vmatprep.subr.bf16.mxu0 %v1607_v16  ;;  %1633 = vmatpush3.bf16.msra.mxu1 %v1632_v31  ;;  %v1617_v39 = vpack.c.bf16 %v661_v35, %v659_v34  ;;  %v1619_v40 = vpack.c.bf16 %v666_v37, %v664_v36  ;;  %v663_v41 = vld [vmem:[#allocation10 + $0xa0] sm:$0xff]  ;;  %v665_v42 = vld [vmem:[#allocation10 + $0xb0] sm:$0xff]  ;;  %v668_v43 = vld [vmem:[#allocation10 + $0xc8] sm:$0xff]  ;;  %v683_v16 = vsub.s32 1, %v678_v14 }
  0xff   : > { %1634 = vmatprep.subr.bf16.mxu1 %v2214_v1  ;;  %v670_v44 = vld [vmem:[#allocation10 + $0xd8] sm:$0xff]  ;;  %v1621_v45 = vpack.c.bf16 %v665_v42, %v663_v41  ;;  %v667_v47 = vld [vmem:[#allocation10 + $0xc0] sm:$0xff]  ;;  %v669_v48 = vld [vmem:[#allocation10 + $0xd0] sm:$0xff]  ;;  %p2907_p13 = scmp.ne.s32.totalorder %s2905_s15, 0 }
 0x100   : > { %v1623_v46 = vpack.c.bf16 %v670_v44, %v668_v43  ;;  %v672_v49 = vld [vmem:[#allocation10 + $0xe8] sm:$0xff]  ;;  %v674_v50 = vld [vmem:[#allocation10 + $0xf8] sm:$0xff]  ;;  %v1625_v51 = vpack.c.bf16 %v669_v48, %v667_v47  ;;  %v671_v53 = vld [vmem:[#allocation10 + $0xe0] sm:$0xff] }
 0x101   : > { %1610 = vmatpush1.bf16.msra.mxu0 %v1609_v21  ;;  %v1627_v52 = vpack.c.bf16 %v674_v50, %v672_v49  ;;  %v673_v54 = vld [vmem:[#allocation10 + $0xf0] sm:$0xff]  ;;  %v796_v57 = vld [vmem:[#allocation12 + $0x20] sm:$0xff]  ;;  %v797_v58 = vld [vmem:[#allocation12 + $0x28] sm:$0xff] }
 0x102   : > { %1612 = vmatprep.subr.bf16.mxu0 %v1611_v22  ;;  %1636 = vmatpush3.bf16.msra.mxu1 %v1635_v38  ;;  %v1629_v55 = vpack.c.bf16 %v673_v54, %v671_v53  ;;  %v642_v56 = vld [vmem:[%s538_s0] sm:$0xff]  ;;  %v1638_v59 = vpack.c.bf16 %v797_v58, %v796_v57  ;;  %v800_v63 = vld [vmem:[#allocation12 + $0x40] sm:$0xff]  ;;  %v801_v2 = vld [vmem:[#allocation12 + $0x48] sm:$0xff]  ;;  %s2904_s0 = sld [smem:[#allocation40_spill]] }
 0x103   : > { %1637 = vmatprep.subr.bf16.mxu1 %v2214_v1  ;;  %v798_v60 = vld [vmem:[#allocation12 + $0x30] sm:$0xff]  ;;  %v799_v61 = vld [vmem:[#allocation12 + $0x38] sm:$0xff]  ;;  %v1644_v3 = vpack.c.bf16 %v801_v2, %v800_v63  ;;  %v804_v7 = vld [vmem:[#allocation12 + $0x60] sm:$0xff] }
 0x104   : > { %v1641_v62 = vpack.c.bf16 %v799_v61, %v798_v60  ;;  %v802_v4 = vld [vmem:[#allocation12 + $0x50] sm:$0xff]  ;;  %v803_v5 = vld [vmem:[#allocation12 + $0x58] sm:$0xff]  ;;  %v805_v8 = vld [vmem:[#allocation12 + $0x68] sm:$0xff] }
 0x105   : > { %1614 = vmatpush1.bf16.msra.mxu0 %v1613_v30  ;;  %v1647_v6 = vpack.c.bf16 %v803_v5, %v802_v4  ;;  %v1650_v9 = vpack.c.bf16 %v805_v8, %v804_v7  ;;  %v806_v10 = vld [vmem:[#allocation12 + $0x70] sm:$0xff]  ;;  %v807_v11 = vld [vmem:[#allocation12 + $0x78] sm:$0xff]  ;;  %v769_v30 = vstv %s1428_s18  ;;  %v886_v41 = vld [vmem:[#allocation13] sm:$0xff] }
 0x106   : > { %1616 = vmatprep.subr.bf16.mxu0 %v1615_v33  ;;  %1639 = vmatpush3.bf16.msra.mxu1 %v1638_v59  ;;  %v1653_v12 = vpack.c.bf16 %v807_v11, %v806_v10  ;;  %v675_v17 = vld [vmem:[%s2820_s5] sm:$0x3]  ;;  %v770_v31 = vadd.s32 %v769_v30, %v678_v14  ;;  %v762_v33 = vld [vmem:[%s547_s17] sm:$0xff]  ;;  %s627_s17 = scalar_lea.vmem [#allocation17], %s2587_s7 }
 0x107   : > { %1640 = vmatprep.subr.bf16.mxu1 %v2214_v1  ;;  %v680_v18 = vrot.slane %v675_v17, %v679_v15  ;;  %v684_v19 = vrot.slane %v675_v17, %v683_v16  ;;  %v887_v42 = vld [vmem:[#allocation13 + $0x8] sm:$0xff]  ;;  %v888_v43 = vld [vmem:[#allocation13 + $0x10] sm:$0xff]  ;;  %v890_v47 = vld [vmem:[#allocation13 + $0x20] sm:$0xff]  ;;  %s1133_s24 = sshll.u32 %s627_s17, 4  ;;  %s1134_s24 = int_to_ptr.vmem [resolvable:$true] %s1133_s24 }
 0x108   : > { %vm773_vm1 = vcmp.lt.s32.totalorder %v770_v31, %v772_v32  ;;  %v1656_v44 = vpack.c.bf16 %v887_v42, %v886_v41  ;;  %v891_v48 = vld [vmem:[#allocation13 + $0x28] sm:$0xff]  ;;  %v892_v50 = vld [vmem:[#allocation13 + $0x30] sm:$0xff]  ;;  %v898_v58 = vld [vmem:[#allocation13 + $0x60] sm:$0xff]  ;;  %s2030_s20 = scalar_lea.vmem %s1134_s24, 128 }
 0x109   : > { %1618 = vmatpush1.bf16.msra.mxu0 %v1617_v39  ;;  %v2636_v37 = vsel %vm773_vm1, 1.0, %v2213_v0  ;;  %v1662_v49 = vpack.c.bf16 %v891_v48, %v890_v47  ;;  %v895_v53 = vld [vmem:[#allocation13 + $0x48] sm:$0xff]  ;;  %v900_v61 = vld [vmem:[#allocation13 + $0x70] sm:$0xff]  ;;  %v980_v2 = vld [vmem:[#allocation15] sm:$0xff]  ;;  %p2031_p8 = scmp.ne.s32.totalorder %s1134_s24, %s2030_s20 }
 0x10a   : > { %1620 = vmatprep.subr.bf16.mxu0 %v1619_v40  ;;  %1642 = vmatpush3.bf16.msra.mxu1 %v1641_v62  ;;  %v899_v59 = vld [vmem:[#allocation13 + $0x68] sm:$0xff]  ;;  %v901_v62 = vld [vmem:[#allocation13 + $0x78] sm:$0xff]  ;;  %v982_v4 = vld [vmem:[#allocation15 + $0x10] sm:$0xff] }
 0x10b   : > { %1643 = vmatprep.subr.bf16.mxu1 %v2214_v1  ;;  %v1674_v60 = vpack.c.bf16 %v899_v59, %v898_v58  ;;  %v1677_v63 = vpack.c.bf16 %v901_v62, %v900_v61  ;;  %v984_v8 = vld [vmem:[#allocation15 + $0x20] sm:$0xff]  ;;  %v986_v11 = vld [vmem:[#allocation15 + $0x30] sm:$0xff]  ;;  %v989_v15 = vld [vmem:[#allocation15 + $0x48] sm:$0xff]  ;;  %p2032_p11 = pnand %p2031_p8, %p2907_p13 }
 0x10c   : > { %v988_v14 = vld [vmem:[#allocation15 + $0x40] sm:$0xff]  ;;  %v990_v17 = vld [vmem:[#allocation15 + $0x50] sm:$0xff] }
 0x10d   : > { %1622 = vmatpush1.bf16.msra.mxu0 %v1621_v45  ;;  %v889_v45 = vld [vmem:[#allocation13 + $0x18] sm:$0xff]  ;;  %v1692_v16 = vpack.c.bf16 %v989_v15, %v988_v14  ;;  %v1430_v31 = vld [vmem:[%s2902_s16] ss:$0 sm:$0xff]  ;;  %p2033_p1 = pneg %p2032_p11 }
 0x10e   : > { %1624 = vmatprep.subr.bf16.mxu0 %v1623_v46  ;;  %1645 = vmatpush3.bf16.msra.mxu1 %v1644_v3  ;;  %v1659_v46 = vpack.c.bf16 %v889_v45, %v888_v43  ;;  %v981_v3 = vld [vmem:[#allocation15 + $0x8] sm:$0xff] }
 0x10f   : > { %1646 = vmatprep.subr.bf16.mxu1 %v2214_v1  ;;  %v1680_v5 = vpack.c.bf16 %v981_v3, %v980_v2 }
 0x111   : > { %1626 = vmatpush1.bf16.msra.mxu0 %v1625_v51  ;;  %v893_v51 = vld [vmem:[#allocation13 + $0x38] sm:$0xff] }
 0x112   : > { %1628 = vmatprep.subr.bf16.mxu0 %v1627_v52  ;;  %1648 = vmatpush3.bf16.msra.mxu1 %v1647_v6  ;;  %v894_v52 = vld [vmem:[#allocation13 + $0x40] sm:$0xff]  ;;  %v983_v6 = vld [vmem:[#allocation15 + $0x18] sm:$0xff] }
 0x113   : > { %1649 = vmatprep.subr.bf16.mxu1 %v2214_v1  ;;  %v1668_v54 = vpack.c.bf16 %v895_v53, %v894_v52  ;;  %v1683_v7 = vpack.c.bf16 %v983_v6, %v982_v4 }
 0x115   : > { %1630 = vmatpush1.bf16.msra.mxu0 %v1629_v55  ;;  %v896_v55 = vld [vmem:[#allocation13 + $0x50] sm:$0xff] }
 0x116   : > { %1655 = vmatprep.subr.bf16.mxu0 %v2214_v1  ;;  %1651 = vmatpush3.bf16.msra.mxu1 %v1650_v9  ;;  %v985_v9 = vld [vmem:[#allocation15 + $0x28] sm:$0xff] }
 0x117   : > { %1652 = vmatprep.subr.bf16.mxu1 %v2214_v1  ;;  %v1686_v10 = vpack.c.bf16 %v985_v9, %v984_v8 }
 0x118   : > { %752 = vmatmul.mubr.f32.vlgmr.msra.gmra.mrb[0].mxu0 %v642_v56  ;;  %v897_v56 = vld [vmem:[#allocation13 + $0x58] sm:$0xff] }
 0x119   : > { %1561 = vmatprep.mubr.msk.f32.mxu0 %vm2215_vm0, %v2213_v0  ;;  %1657 = vmatpush3.bf16.msra.mxu0 %v1656_v44  ;;  %v1671_v57 = vpack.c.bf16 %v897_v56, %v896_v55  ;;  %v1432_v44 = vld [vmem:[%s2904_s0] ss:$0 sm:$0xff] }
 0x11a   : > { %1654 = vmatpush3.bf16.msra.mxu1 %v1653_v12  ;;  %1658 = vmatprep.subr.bf16.mxu0 %v2214_v1  ;;  %v987_v12 = vld [vmem:[#allocation15 + $0x38] sm:$0xff] }
 0x11b   : > { %1679 = vmatprep.subr.bf16.mxu1 %v2214_v1  ;;  %v1689_v13 = vpack.c.bf16 %v987_v12, %v986_v11 }
 0x11d   : > { %1660 = vmatpush3.bf16.msra.mxu0 %v1659_v46  ;;  %v1074_v46 = vld [vmem:[%s556_s30] sm:$0xff]  ;;  %s2906_s30 = sld [smem:[#allocation42_spill]] }
 0x11e   : > { %1661 = vmatprep.subr.bf16.mxu0 %v2214_v1 }
 0x121   : > { %1663 = vmatpush3.bf16.msra.mxu0 %v1662_v49 }
 0x122   : > { %1664 = vmatprep.subr.bf16.mxu0 %v2214_v1 }
 0x1eb   : > { %v753_v20 = vpop.f32.mrb[0].mxu0 }
 0x1ec   : > { %v755_v21 = vpop.f32.mrb[1].mxu0  ;;  %v754_v22 = vadd.f32 %v753_v20, %v680_v18  ;;  %v991_v18 = vld [vmem:[#allocation15 + $0x58] sm:$0xff]  ;;  %v992_v20 = vld [vmem:[#allocation15 + $0x60] sm:$0xff] }
 0x1ed   : > { %v756_v23 = vadd.f32 %v755_v21, %v684_v19  ;;  %v1695_v19 = vpack.c.bf16 %v991_v18, %v990_v17  ;;  %v993_v21 = vld [vmem:[#allocation15 + $0x68] sm:$0xff] }
 0x1ee   : > { %v777_v25 = vmul.f32 %v754_v22, %v754_v22 }
 0x1ef   : > { %v758_v24 = vmin.f32 %v756_v23, 10.0 }
 0x1f1   : > { %v759_v26 = vmul.f32 0.5, %v758_v24  ;;  %v776_v27 = vadd.f32 1.0, %v758_v24 }
 0x1f3   : > { %v760_v28 = vmul.f32 1.442695, %v759_v26  ;;  %v778_v29 = vsub.f32 %v776_v27, %v777_v25 }
 0x1f5   : > { %1826 = vpow2.f32 %v760_v28 }
 0x1ff   : > { %v1827_v34 = vpop.eup %1826 }
 0x200   : > { %v763_v35 = vmul.f32 %v1827_v34, %v762_v33  ;;  %v779_v36 = vmul.f32 %v1827_v34, %v1827_v34 }
 0x202   : > { %v764_v38 = vadd.f32 %v763_v35, %v754_v22  ;;  %v780_v39 = vsub.f32 %v778_v29, %v779_v36  ;;  %v1698_v22 = vpack.c.bf16 %v993_v21, %v992_v20  ;;  %v994_v35 = vld [vmem:[#allocation15 + $0x70] sm:$0xff]  ;;  %v995_v36 = vld [vmem:[#allocation15 + $0x78] sm:$0xff] }
 0x204   : > { %1527 = vmatmul.mubr.f32.vlgmr.msra.gmra.mrb[0].mxu1 %v764_v38  ;;  %v781_v40 = vmul.f32 %v2636_v37, %v780_v39  ;;  %765 = vst [vmem:[%s620_s2] sm:$0xff] %v764_v38  ;;  %v1701_v38 = vpack.c.bf16 %v995_v36, %v994_v35  ;;  %v1431_v39 = vld [vmem:[%s2903_s23] ss:$0 sm:$0xff] }
 0x205   : > { %1596 = vmatprep.mubr.msk.f32.mxu1 %vm2215_vm0, %v2213_v0  ;;  %v1665_v0 = vpack.c.bf16 %v893_v51, %v892_v50  ;;  %1681 = vmatpush3.bf16.msra.mxu1 %v1680_v5 }
 0x206   : > { %782 = vadd.xlane.f32.xlu0 %v781_v40  ;;  %1682 = vmatprep.subr.bf16.mxu1 %v2214_v1 }
 0x207   : > { %1666 = vmatpush3.bf16.msra.mxu0 %v1665_v0 }
 0x208   : > { %1667 = vmatprep.subr.bf16.mxu0 %v2214_v1 }
 0x209   : > { %1684 = vmatpush3.bf16.msra.mxu1 %v1683_v7 }
 0x20a   : > { %1685 = vmatprep.subr.bf16.mxu1 %v2214_v1 }
 0x20b   : > { %1669 = vmatpush3.bf16.msra.mxu0 %v1668_v54 }
 0x20c   : > { %1670 = vmatprep.subr.bf16.mxu0 %v2214_v1 }
 0x20d   : > { %1687 = vmatpush3.bf16.msra.mxu1 %v1686_v10 }
 0x20e   : > { %1688 = vmatprep.subr.bf16.mxu1 %v2214_v1 }
 0x20f   : > { %1672 = vmatpush3.bf16.msra.mxu0 %v1671_v57 }
 0x210   : > { %1673 = vmatprep.subr.bf16.mxu0 %v2214_v1 }
 0x211   : > { %1690 = vmatpush3.bf16.msra.mxu1 %v1689_v13 }
 0x212   : > { %1691 = vmatprep.subr.bf16.mxu1 %v2214_v1 }
 0x213   : > { %1675 = vmatpush3.bf16.msra.mxu0 %v1674_v60 }
 0x214   : > { %1676 = vmatprep.subr.bf16.mxu0 %v2214_v1 }
 0x215   : > { %1693 = vmatpush3.bf16.msra.mxu1 %v1692_v16 }
 0x216   : > { %1694 = vmatprep.subr.bf16.mxu1 %v2214_v1 }
 0x217   : > { %1678 = vmatpush3.bf16.msra.mxu0 %v1677_v63 }
 0x219   : > { %1696 = vmatpush3.bf16.msra.mxu1 %v1695_v19 }
 0x21a   : > { %1697 = vmatprep.subr.bf16.mxu1 %v2214_v1 }
 0x21d   : > { %1699 = vmatpush3.bf16.msra.mxu1 %v1698_v22 }
 0x21e   : > { %1700 = vmatprep.subr.bf16.mxu1 %v2214_v1 }
 0x221   : > { %1702 = vmatpush3.bf16.msra.mxu1 %v1701_v38 }
 0x293   : > { %v783_v23 = vpop.xlane.xlu0 %782 }
 0x294   : > { %v784_v24 = vrot.slane %v783_v23, 4 }
 0x296   : > { %v785_v25 = vadd.f32 %v784_v24, %v783_v23 }
 0x298   : > { %v786_v26 = vrot.slane %v785_v25, 2 }
 0x29a   : > { %v787_v27 = vadd.f32 %v786_v26, %v785_v25 }
 0x29c   : > { %v788_v28 = vrot.slane %v787_v27, 1 }
 0x29e   : > { %v789_v29 = vadd.f32 %v788_v28, %v787_v27 }
 0x2a0   : > { %1703 = vpush %v789_v29 }
 0x2d1   : > { %s1704_s4 = spop %1703 }
 0x2d2   : > { %s791_s8 = smul.f32 -0.5, %s1704_s4 }
 0x2d4   : > { %v1087_v30 = vstv %s791_s8  ;;  %s2681_s8 = scalar_lea.hbm %s2906_s30, %s2673_s27 }
 0x2d5   : > { %1088 = vst [vmem:[%s634_s29] sm:$0xff] %v1087_v30  ;;  %s2216_s29 = smov [#allocation17]  }
 0x2d6   : > { %s2034_s16 = sshll.u32 %s2216_s29, 4  ;;  %s2035_s16 = int_to_ptr.vmem [resolvable:$false] %s2034_s16 }
 0x2d7   : > { %v881_v32 = vpop.f32.mrb[0].mxu1  ;;  %s2036_s13 = scalar_lea.vmem %s2035_s16, 256  ;;  %p2037_p5 = scmp.lt.s32.totalorder %s1134_s24, %s2035_s16 }
 0x2d8   : > { %v882_v33 = vadd.f32 %v1430_v31, %v881_v32  ;;  %v1528_v1 = vpop.f32.mrb[1].mxu1  ;;  %p2038_p4 = scmp.lt.s32.totalorder %s2036_s13, %s2030_s20 }
 0x2da   : > { %v885_v34 = vmax.f32 %v882_v33, 0.0  ;;  %p2039_p2 = por %p2038_p4, %p2037_p5 }
 0x2dc   : > { %1562 = vmatmul.mubr.f32.vlgmr.msra.gmra.mrb[2].mxu0 %v885_v34  ;;  %p2040_p9 = pnand %p2039_p2, %p2033_p1 }
 0x3af   : > { %v975_v40 = vpop.f32.mrb[2].mxu0 }
 0x3b0   : > { %v976_v41 = vadd.f32 %v1431_v39, %v975_v40  ;;  %v1563_v42 = vpop.f32.mrb[3].mxu0 }
 0x3b2   : > { %v979_v43 = vmax.f32 %v976_v41, 0.0 }
 0x3b4   : > { %1597 = vmatmul.mubr.f32.vlgmr.msra.gmra.mrb[2].mxu1 %v979_v43 }
 0x487   : > { %v1069_v45 = vpop.f32.mrb[2].mxu1 }
 0x488   : > { %v1070_v47 = vadd.f32 %v1432_v44, %v1069_v45  ;;  %v1598_v48 = vpop.f32.mrb[3].mxu1 }
 0x48a   : > { %1073 = vst [vmem:[%s627_s17] sm:$0xff] %v1070_v47  ;;  %v1075_v49 = vsub.f32 %v1070_v47, %v1074_v46 }
 0x48c   : > { %v1076_v50 = vmul.f32 %v2636_v37, %v1075_v49 }
 0x48e   : > { %v1077_v51 = vmul.f32 %v1076_v50, %v1076_v50 }
 0x490   : > { %1078 = vadd.xlane.f32.xlu0 %v1077_v51 }
 0x491   : > { %2043 = shalt.err (!%p2040_p9)
}
 0x492   : > { %s2044_s25 = scalar_lea.hbm %s2681_s8, 128  ;;  %s2048_s23 = scalar_lea.hbm %s2906_s30, 384 }
 0x493   : > { %p2045_p10 = scmp.ne.s32.totalorder %s2681_s8, %s2044_s25  ;;  %p2049_p12 = scmp.lt.u32.totalorder %s2681_s8, %s2906_s30 }
 0x494   : > { %p2050_p0 = scmp.lt.u32.totalorder %s2048_s23, %s2044_s25  ;;  %p2052_p8 = scmp.lt.u32.totalorder %s2044_s25, %s2681_s8 }
 0x495   : > { %p2046_p3 = pnand %p2045_p10, %p2907_p13 }
 0x496   : > { %p2051_p6 = por %p2050_p0, %p2049_p12 }
 0x497   : > { %p2047_p7 = pneg %p2046_p3 }
 0x498   : > { %p2053_p11 = por %p2052_p8, %p2051_p6 }
 0x49a   : > { %p2054_p1 = pnand %p2053_p11, %p2047_p7 }
 0x49c   : > { %2057 = shalt.err (!%p2054_p1)
}
 0x49d   : > { %1730 = dma.vmem_to_hbm [thread:$0]  (%p2907_p13), %s1134_s24, 128, %s2681_s8, %s2685_s11  }
 0x49e   : > { %s2908_s18 = sld [smem:[#allocation41_spill]]  ;;  %s1120_s20 = sshll.u32 %s620_s2, 4  ;;  %s2713_s20 = int_to_ptr.vmem [resolvable:$true] %s1120_s20 }
 0x49f   : > { %s2909_s13 = sld [smem:[#allocation43_spill]]  ;;  %s1092_s26 = scalar_lea.sflag [#allocation6], %s2584_s12 }
 0x4a0   : > { %s2058_s14 = scalar_lea.vmem %s2713_s20, 128  ;;  %s2217_s24 = smov [#allocation16]  }
 0x4a1   : > { %p2059_p5 = scmp.ne.s32.totalorder %s2713_s20, %s2058_s14  ;;  %s2062_s8 = sshll.u32 %s2217_s24, 4  ;;  %s2063_s8 = int_to_ptr.vmem [resolvable:$false] %s2062_s8 }
 0x4a2   : > { %s2064_s2 = scalar_lea.vmem %s2063_s8, 256  ;;  %p2065_p9 = scmp.lt.s32.totalorder %s2713_s20, %s2063_s8 }
 0x4a3   : > { %p2060_p4 = pnand %p2059_p5, %p2907_p13  ;;  %p2066_p10 = scmp.lt.s32.totalorder %s2064_s2, %s2058_s14 }
 0x4a4   : > { %s2709_s4 = scalar_lea.hbm %s2908_s18, %s2673_s27 }
 0x4a5   : > { %s2719_s25 = scalar_lea.hbm %s2909_s13, %s2673_s27  ;;  %p2061_p2 = pneg %p2060_p4 }
 0x4a6   : > { %p2067_p3 = por %p2066_p10, %p2065_p9 }
 0x4a8   : > { %p2068_p7 = pnand %p2067_p3, %p2061_p2 }
 0x4aa   : > { %2071 = shalt.err (!%p2068_p7)
}
 0x4ab   : > { %s2072_s23 = scalar_lea.hbm %s2709_s4, 128  ;;  %s2076_s0 = scalar_lea.hbm %s2908_s18, 384 }
 0x4ac   : > { %p2073_p12 = scmp.ne.s32.totalorder %s2709_s4, %s2072_s23  ;;  %p2077_p8 = scmp.lt.u32.totalorder %s2709_s4, %s2908_s18 }
 0x4ad   : > { %p2078_p11 = scmp.lt.u32.totalorder %s2076_s0, %s2072_s23  ;;  %p2080_p5 = scmp.lt.u32.totalorder %s2072_s23, %s2709_s4 }
 0x4ae   : > { %p2074_p0 = pnand %p2073_p12, %p2907_p13 }
 0x4af   : > { %p2079_p1 = por %p2078_p11, %p2077_p8 }
 0x4b0   : > { %p2075_p6 = pneg %p2074_p0 }
 0x4b1   : > { %p2081_p4 = por %p2080_p5, %p2079_p1 }
 0x4b3   : > { %p2082_p2 = pnand %p2081_p4, %p2075_p6 }
 0x4b5   : > { %2085 = shalt.err (!%p2082_p2)
}
 0x4b6   : > { %1729 = dma.vmem_to_hbm [thread:$0]  (%p2907_p13), %s2713_s20, 128, %s2709_s4, %s1092_s26  }
 0x4b7   : > { %s2086_s16 = scalar_lea.vmem %s2675_s28, 128  ;;  %s2218_s14 = smov [#allocation19]  }
 0x4b8   : > { %p2087_p9 = scmp.ne.s32.totalorder %s2675_s28, %s2086_s16  ;;  %s2090_s24 = sshll.u32 %s2218_s14, 4  ;;  %s2091_s24 = int_to_ptr.vmem [resolvable:$false] %s2090_s24 }
 0x4b9   : > { %s2092_s8 = scalar_lea.vmem %s2091_s24, 256  ;;  %p2093_p7 = scmp.lt.s32.totalorder %s2675_s28, %s2091_s24 }
 0x4ba   : > { %p2088_p10 = pnand %p2087_p9, %p2907_p13  ;;  %p2094_p12 = scmp.lt.s32.totalorder %s2092_s8, %s2086_s16 }
 0x4bc   : > { %p2089_p3 = pneg %p2088_p10  ;;  %p2095_p0 = por %p2094_p12, %p2093_p7 }
 0x4be   : > { %p2096_p6 = pnand %p2095_p0, %p2089_p3 }
 0x4c0   : > { %2099 = shalt.err (!%p2096_p6)
}
 0x4c1   : > { %s2100_s4 = scalar_lea.hbm %s2719_s25, 128  ;;  %s2104_s2 = scalar_lea.hbm %s2909_s13, 384 }
 0x4c2   : > { %p2101_p8 = scmp.ne.s32.totalorder %s2719_s25, %s2100_s4  ;;  %p2105_p5 = scmp.lt.u32.totalorder %s2719_s25, %s2909_s13 }
 0x4c3   : > { %p2106_p4 = scmp.lt.u32.totalorder %s2104_s2, %s2100_s4  ;;  %p2108_p9 = scmp.lt.u32.totalorder %s2100_s4, %s2719_s25 }
 0x4c4   : > { %p2102_p11 = pnand %p2101_p8, %p2907_p13 }
 0x4c5   : > { %p2107_p2 = por %p2106_p4, %p2105_p5 }
 0x4c6   : > { %p2103_p1 = pneg %p2102_p11 }
 0x4c7   : > { %p2109_p10 = por %p2108_p9, %p2107_p2 }
 0x4c9   : > { %p2110_p3 = pnand %p2109_p10, %p2103_p1 }
 0x4cb   : > { %2113 = shalt.err (!%p2110_p3)
}
 0x4cc   : > { %1731 = dma.vmem_to_hbm [thread:$0]  (%p2907_p13), %s2675_s28, 128, %s2719_s25, %s2685_s11  }
 0x4cd   : > { %s641_s9 = scalar_lea.vmem [#allocation20], %s2587_s7  ;;  %s2910_s11 = sld [smem:[#allocation44_spill]] }
 0x4ce   : > { %s1159_s0 = sshll.u32 %s641_s9, 4  ;;  %s1107_s16 = scalar_lea.sflag [#allocation21], %s2584_s12  ;;  %s2766_s0 = int_to_ptr.vmem [resolvable:$true] %s1159_s0 }
 0x4cf   : > { %s2114_s14 = scalar_lea.vmem %s2766_s0, 128  ;;  %s2219_s7 = smov [#allocation20]  }
 0x4d0   : > { %p2115_p7 = scmp.ne.s32.totalorder %s2766_s0, %s2114_s14  ;;  %s2118_s24 = sshll.u32 %s2219_s7, 4  ;;  %s2119_s24 = int_to_ptr.vmem [resolvable:$false] %s2118_s24 }
 0x4d1   : > { %s2120_s8 = scalar_lea.vmem %s2119_s24, 256  ;;  %p2121_p6 = scmp.lt.s32.totalorder %s2766_s0, %s2119_s24 }
 0x4d2   : > { %p2116_p12 = pnand %p2115_p7, %p2907_p13  ;;  %p2122_p8 = scmp.lt.s32.totalorder %s2120_s8, %s2114_s14 }
 0x4d3   : > { %s2772_s25 = scalar_lea.hbm %s2910_s11, %s2673_s27 }
 0x4d4   : > { %p2117_p0 = pneg %p2116_p12  ;;  %p2123_p11 = por %p2122_p8, %p2121_p6 }
 0x4d6   : > { %p2124_p1 = pnand %p2123_p11, %p2117_p0 }
 0x51d   : > { %v1079_v37 = vpop.xlane.xlu0 %1078 }
 0x51e   : > { %v1080_v0 = vrot.slane %v1079_v37, 4 }
 0x520   : > { %v1081_v52 = vadd.f32 %v1080_v0, %v1079_v37 }
 0x522   : > { %v1082_v53 = vrot.slane %v1081_v52, 2 }
 0x524   : > { %v1083_v54 = vadd.f32 %v1082_v53, %v1081_v52 }
 0x526   : > { %v1084_v55 = vrot.slane %v1083_v54, 1 }
 0x528   : > { %v1085_v56 = vadd.f32 %v1084_v55, %v1083_v54 }
 0x52a   : > { %1705 = vpush %v1085_v56 }
 0x55b   : > { %s1706_s17 = spop %1705 }
 0x55c   : > { %v1089_v57 = vstv %s1706_s17 }
 0x55d   : > { %1090 = vst [vmem:[%s641_s9] sm:$0xff] %v1089_v57 }
 0x55e   : > { %2127 = shalt.err (!%p2124_p1)
}
 0x55f   : > { %s2128_s12 = scalar_lea.hbm %s2772_s25, 128  ;;  %s2132_s20 = scalar_lea.hbm %s2910_s11, 384 }
 0x560   : > { %p2129_p5 = scmp.ne.s32.totalorder %s2772_s25, %s2128_s12  ;;  %p2133_p9 = scmp.lt.u32.totalorder %s2772_s25, %s2910_s11 }
 0x561   : > { %p2134_p10 = scmp.lt.u32.totalorder %s2132_s20, %s2128_s12  ;;  %p2136_p7 = scmp.lt.u32.totalorder %s2128_s12, %s2772_s25 }
 0x562   : > { %p2130_p4 = pnand %p2129_p5, %p2907_p13 }
 0x563   : > { %p2135_p3 = por %p2134_p10, %p2133_p9 }
 0x564   : > { %p2131_p2 = pneg %p2130_p4 }
 0x565   : > { %p2137_p12 = por %p2136_p7, %p2135_p3 }
 0x567   : > { %p2138_p0 = pnand %p2137_p12, %p2131_p2 }
 0x569   : > { %2141 = shalt.err (!%p2138_p0)
}
 0x56a   : > { %1732 = dma.vmem_to_hbm [thread:$0]  (%p2907_p13), %s2766_s0, 128, %s2772_s25, %s1107_s16  }
 0x56b PF: > { %s2911_s23 = sld [smem:[#allocation30_spill]]  ;;  %s2912_s19 = sld [smem:[#allocation29_spill]] }
 0x56c   : > { %s2913_s9 = sld [smem:[#allocation34_spill]] }
 0x571   : > { %p1782_p6 = scmp.ge.s32.totalorder %s2911_s23, 2  ;;  %s1171_s17 = sand.u32 1, %s2912_s19  }
 0x572   : > { %p2914_p8 = scmp.ne.s32.totalorder %s2913_s9, 0  ;;  %s1172_s29 = scalar_lea.sflag [#allocation6], %s1171_s17 }
 0x574   : > { %p1761_p11 = pnand %p1782_p6, %p2914_p8 }
 0x576   : > { %2175 = dma.done.wait (!%p1761_p11), %s1172_s29, 128  }
 0x577   : > { %2177 = vsyncadd (!%p1761_p11), %s1172_s29, 4294967168  ;;  %s2915_s28 = sadd.s32 4294967294, %s2911_s23  }
 0x578   : > { %s1180_s14 = sand.u32 1, %s2915_s28  }
 0x579   : > { %s1181_s7 = scalar_lea.sflag [#allocation18], %s1180_s14 }
 0x57a   : > { %2179 = dma.done.wait (!%p1761_p11), %s1181_s7, 256  }
 0x57b   : > { %2181 = vsyncadd (!%p1761_p11), %s1181_s7, 4294967040  ;;  %s1199_s15 = scalar_lea.sflag [#allocation21], %s1171_s17 }
 0x57c   : > { %2183 = dma.done.wait (!%p1761_p11), %s1199_s15, 128  }
 0x57d   : > { %2185 = vsyncadd (!%p1761_p11), %s1199_s15, 4294967168  ;;  %s2916_s23 = sld [smem:[#allocation31_spill]]  ;;  %s2917_s0 = sld [smem:[#allocation32_spill]] }
 0x57e   : > { %s2918_s20 = smov %s2192_s21  ;;  %s2919_s21 = smov %s2196_s22 }
 0x583   : > { %p41_p13 = scmp.ge.s32.totalorder %s2916_s23, 5   ;;  %s2920_s22 = smov %s2917_s0 }
 0x585   :  { %43 = sbr.rel (!%p41_p13) target bundleno = 25 (0x19), region = 198 }
 0x58c   :  { %1204 = vsyncpa [#allocation5], 1 }
 0x58d   :  { %1206 = vsyncpa [#allocation5 + $0x1], 1 }
 0x58e   :  { %1207 = vsyncpa [#allocation8], 1 }
 0x58f   :  { %1209 = vsyncpa [#allocation8 + $0x1], 1 }
 0x590   :  { %1210 = vsyncpa [#allocation11], 1 }
 0x591   :  { %1211 = vsyncpa [#allocation14], 1 }
 0x592   :  { %1212 = vsyncpa [#allocation6], 1 }
 0x593   :  { %1214 = vsyncpa [#allocation6 + $0x1], 1 }
 0x594   :  { %1215 = vsyncpa [#allocation18], 1 }
 0x595   :  { %1217 = vsyncpa [#allocation18 + $0x1], 1 }
 0x596   :  { %1218 = vsyncpa [#allocation21], 1 }
 0x597   :  { %1220 = vsyncpa [#allocation21 + $0x1], 1 }

</bundles_post_ra>
